<compile_context>
chip_gen: v6e
topology: v6e:2x2x1
jax: 0.10.0
libtpu: 0.0.40
codegen_flags: <defaults>
</compile_context>

<pallas_src>
import jax
import jax.numpy as jnp
from jax.experimental import pallas as pl
from jax.experimental.pallas import tpu as pltpu

HIDDEN = 32
EPS = 1e-5          # BatchNorm eps (PyTorch default)
NEG_SLOPE = 0.2     # HANConv leaky_relu negative slope (PyG default)

NODES = ("ingredient", "taste")
EDGES = (("ingredient", "part_of", "taste"), ("taste", "contains", "ingredient"))


# ----------------------------------------------------------------------------
# Fused kernel: BN + node projection for both node types, then HAN attention
# aggregation for both edge types.  One launch, two outputs.
# ----------------------------------------------------------------------------
def taste_gnn_kernel(x_i_ref, x_t_ref, gamma_ref, beta_ref,
                     w_i_ref, b_i_ref, w_t_ref, b_t_ref,
                     att_po_ref, att_co_ref, adj_po_ref, adj_co_ref,
                     o_i_ref, o_t_ref):
    gamma = gamma_ref[...]
    beta = beta_ref[...]

    def bn_proj(x_ref, w_ref, b_ref):
        # BatchNorm with training-mode (biased) batch statistics, computed in a single pass
        # (sum and sum-of-squares), fused with the HANConv node projection h = BN(x) @ W + b.
        x = x_ref[...].astype(jnp.float32)                               # [N, D]
        inv_n = jnp.float32(1.0 / x.shape[0])
        mean = jnp.sum(x, axis=0, keepdims=True) * inv_n                 # [1, D]
        var = jnp.sum(x * x, axis=0, keepdims=True) * inv_n - mean * mean
        xn = (x - mean) * jax.lax.rsqrt(var + EPS) * gamma + beta
        # TODO(synk): DictDropout modeled as eval-mode identity (training dropout masks not generated).
        return jnp.dot(xn, w_ref[...], preferred_element_type=jnp.float32) + b_ref[...]

    h_i = bn_proj(x_i_ref, w_i_ref, b_i_ref)                             # [Ni, D]
    h_t = bn_proj(x_t_ref, w_t_ref, b_t_ref)                             # [Nt, D]

    def attend(h_src, h_dst, att_ref, adj_ref):
        att = att_ref[...]                                               # [2, D]: row0=att_src, row1=att_dst
        # a_src needs to be lane-oriented ([1, Ns]) to broadcast across logits columns; this
        # single small contraction puts src nodes directly on the output lane axis (no XLU
        # transpose of a skinny [Ns, 1] vector).
        a_src = jax.lax.dot_general(att[0:1, :], h_src,
                                    (((1,), (1,)), ((), ())),
                                    preferred_element_type=jnp.float32)  # [1, Ns]
        # a_dst stays in its natural sublane orientation -> VPU multiply + XLU lane reduce.
        a_dst = jnp.sum(h_dst * att[1:2, :], axis=-1, keepdims=True)     # [Nd, 1]

        mask = adj_ref[...] != 0                                         # int8 adjacency
        mask_f = mask.astype(jnp.float32)
        logits = a_dst + a_src                                           # [Nd, Ns]
        # leaky_relu fused with the edge-existence mask in one select
        logits = jnp.where(mask,
                           jnp.where(logits >= 0.0, logits, NEG_SLOPE * logits),
                           jnp.float32(-1e30))
        m = jnp.max(logits, axis=-1, keepdims=True)                      # [Nd, 1]
        p = jnp.exp(logits - m) * mask_f                                 # masked / empty rows -> 0
        denom = jnp.sum(p, axis=-1, keepdims=True)
        inv = pl.reciprocal(jnp.where(denom > 0.0, denom, 1.0), approx=True)
        attn = p * inv                                                   # rows w/o in-edges -> all zeros
        out = jnp.dot(attn, h_src, preferred_element_type=jnp.float32)   # [Nd, D]
        # HANConv per-metapath ReLU; the outer DictActivate ReLU is idempotent.
        return jnp.maximum(out, 0.0)

    # ingredient --part_of--> taste  (dst = taste)
    o_t_ref[...] = attend(h_i, h_t, att_po_ref, adj_po_ref)
    # taste --contains--> ingredient (dst = ingredient)
    o_i_ref[...] = attend(h_t, h_i, att_co_ref, adj_co_ref)


# ----------------------------------------------------------------------------
# Glue
# ----------------------------------------------------------------------------
def _dense_adj_int8(edge_index, n_dst, n_src):
    # TODO(synk): for large sparse graphs, replace the dense O(Nd*Ns) int8 mask with CSR
    # offsets/edge lists in SMEM via PrefetchScalarGridSpec and tile dst rows with a
    # "parallel" grid axis (per-generation tile sizes, explicit vmem_limit_bytes).
    src, dst = edge_index[0], edge_index[1]
    adj = jnp.zeros((n_dst, n_src), jnp.int8)
    return adj.at[dst, src].set(1)


def taste_gnn_forward(x_dict, edge_index_dict, params):
    x_dict = {k: v for k, v in x_dict.items() if k in NODES}
    edge_index_dict = {k: v for k, v in edge_index_dict.items() if k in EDGES}

    x_i = x_dict["ingredient"]
    x_t = x_dict["taste"]
    n_i, d = x_i.shape
    n_t = x_t.shape[0]

    adj_po = _dense_adj_int8(edge_index_dict[("ingredient", "part_of", "taste")], n_t, n_i)
    adj_co = _dense_adj_int8(edge_index_dict[("taste", "contains", "ingredient")], n_i, n_t)

    # pack per-edge-type attention vectors: row 0 = att_src, row 1 = att_dst
    att_po = jnp.concatenate([params["att_src"]["ingredient__part_of__taste"],
                              params["att_dst"]["ingredient__part_of__taste"]], axis=0)
    att_co = jnp.concatenate([params["att_src"]["taste__contains__ingredient"],
                              params["att_dst"]["taste__contains__ingredient"]], axis=0)

    def full(shape):
        return pl.BlockSpec(shape, lambda i, _s=shape: tuple(0 for _ in _s))

    out_i, out_t = pl.pallas_call(
        taste_gnn_kernel,
        out_shape=(jax.ShapeDtypeStruct((n_i, d), jnp.float32),
                   jax.ShapeDtypeStruct((n_t, d), jnp.float32)),
        grid=(1,),
        in_specs=[
            full((n_i, d)), full((n_t, d)),          # x_ingredient, x_taste
            full((1, d)), full((1, d)),              # bn gamma, beta (shared across node types)
            full((d, d)), full((1, d)),              # W_ingredient, b_ingredient
            full((d, d)), full((1, d)),              # W_taste, b_taste
            full((2, d)), full((2, d)),              # att (part_of), att (contains)
            full((n_t, n_i)), full((n_i, n_t)),      # adj (taste<-ing), adj (ing<-taste), int8
        ],
        out_specs=(full((n_i, d)), full((n_t, d))),
        compiler_params=pltpu.CompilerParams(dimension_semantics=("arbitrary",)),
    )(x_i, x_t, params["bn_gamma"], params["bn_beta"],
      params["proj_w"]["ingredient"], params["proj_b"]["ingredient"],
      params["proj_w"]["taste"], params["proj_b"]["taste"],
      att_po, att_co, adj_po, adj_co)

    return {"ingredient": out_i, "taste": out_t}


if __name__ == "__main__":
    key = jax.random.PRNGKey(0)
    N_ING, N_TASTE, D = 16, 8, HIDDEN
    ks = jax.random.split(key, 10)

    # node features
    x_dict = {
        "ingredient": jax.random.normal(ks[0], (N_ING, D), jnp.float32),
        "taste": jax.random.normal(ks[1], (N_TASTE, D), jnp.float32),
        "user": jax.random.normal(ks[2], (4, D), jnp.float32),  # filtered out by TasteGNN
    }

    # deterministic bipartite edges (no duplicates)
    src_po = jnp.arange(N_ING, dtype=jnp.int32)
    ei_part_of = jnp.stack([src_po, src_po % N_TASTE])          # ingredient -> taste, [2, 16]
    src_ct = jnp.concatenate([jnp.arange(N_TASTE), jnp.arange(N_TASTE)]).astype(jnp.int32)
    dst_ct = jnp.concatenate([jnp.arange(N_TASTE), jnp.arange(N_TASTE) + N_TASTE]).astype(jnp.int32)
    ei_contains = jnp.stack([src_ct, dst_ct])                   # taste -> ingredient, [2, 16]
    edge_index_dict = {
        ("ingredient", "part_of", "taste"): ei_part_of,
        ("taste", "contains", "ingredient"): ei_contains,
        ("user", "likes", "taste"): jnp.zeros((2, 1), jnp.int32),  # filtered out
    }

    # deterministic parameters (shapes per HANConv(hidden, hidden, metadata) + BatchNorm(hidden))
    params = {
        "bn_gamma": jnp.ones((1, D), jnp.float32),
        "bn_beta": jnp.zeros((1, D), jnp.float32),
        "proj_w": {
            "ingredient": 0.1 * jax.random.normal(ks[3], (D, D), jnp.float32),
            "taste": 0.1 * jax.random.normal(ks[4], (D, D), jnp.float32),
        },
        "proj_b": {
            "ingredient": 0.01 * jax.random.normal(ks[5], (1, D), jnp.float32),
            "taste": 0.01 * jax.random.normal(ks[6], (1, D), jnp.float32),
        },
        "att_src": {
            "ingredient__part_of__taste": 0.1 * jax.random.normal(ks[7], (1, D), jnp.float32),
            "taste__contains__ingredient": 0.1 * jax.random.normal(ks[8], (1, D), jnp.float32),
        },
        "att_dst": {
            "ingredient__part_of__taste": 0.1 * jax.random.normal(ks[9], (1, D), jnp.float32),
            "taste__contains__ingredient": 0.1 * jax.random.normal(ks[7], (1, D), jnp.float32),
        },
    }

    out = taste_gnn_forward(x_dict, edge_index_dict, params)
    out = jax.block_until_ready(out)
    assert out["taste"].shape == (N_TASTE, D) and out["ingredient"].shape == (N_ING, D)
    assert bool(jnp.all(jnp.isfinite(out["taste"]))) and bool(jnp.all(jnp.isfinite(out["ingredient"])))
    print("KERNEL_OK")
</pallas_src>

<mosaic_0001>
module attributes {stable_mosaic.version = 11 : i64} {
  func.func @taste_gnn_kernel(%arg0: i32, %arg1: memref<16x32xf32, #tpu.memory_space<vmem>>, %arg2: memref<8x32xf32, #tpu.memory_space<vmem>>, %arg3: memref<1x32xf32, #tpu.memory_space<vmem>>, %arg4: memref<1x32xf32, #tpu.memory_space<vmem>>, %arg5: memref<32x32xf32, #tpu.memory_space<vmem>>, %arg6: memref<1x32xf32, #tpu.memory_space<vmem>>, %arg7: memref<32x32xf32, #tpu.memory_space<vmem>>, %arg8: memref<1x32xf32, #tpu.memory_space<vmem>>, %arg9: memref<2x32xf32, #tpu.memory_space<vmem>>, %arg10: memref<2x32xf32, #tpu.memory_space<vmem>>, %arg11: memref<8x16xi8, #tpu.memory_space<vmem>>, %arg12: memref<16x8xi8, #tpu.memory_space<vmem>>, %arg13: memref<16x32xf32, #tpu.memory_space<vmem>>, %arg14: memref<8x32xf32, #tpu.memory_space<vmem>>) attributes {dimension_semantics = [#tpu.dimension_semantics<arbitrary>], iteration_bounds = array<i64: 1>, scalar_prefetch = 0 : i64, scratch_operands = 0 : i64, tpu.core_type = #tpu.core_type<tc>, window_params = [{pipeline_mode = #tpu.pipeline_mode<synchronous>, transform_indices = @transform_0, window_bounds = array<i64: 16, 32>}, {pipeline_mode = #tpu.pipeline_mode<synchronous>, transform_indices = @transform_1, window_bounds = array<i64: 8, 32>}, {pipeline_mode = #tpu.pipeline_mode<synchronous>, transform_indices = @transform_2, window_bounds = array<i64: 1, 32>}, {pipeline_mode = #tpu.pipeline_mode<synchronous>, transform_indices = @transform_3, window_bounds = array<i64: 1, 32>}, {pipeline_mode = #tpu.pipeline_mode<synchronous>, transform_indices = @transform_4, window_bounds = array<i64: 32, 32>}, {pipeline_mode = #tpu.pipeline_mode<synchronous>, transform_indices = @transform_5, window_bounds = array<i64: 1, 32>}, {pipeline_mode = #tpu.pipeline_mode<synchronous>, transform_indices = @transform_6, window_bounds = array<i64: 32, 32>}, {pipeline_mode = #tpu.pipeline_mode<synchronous>, transform_indices = @transform_7, window_bounds = array<i64: 1, 32>}, {pipeline_mode = #tpu.pipeline_mode<synchronous>, transform_indices = @transform_8, window_bounds = array<i64: 2, 32>}, {pipeline_mode = #tpu.pipeline_mode<synchronous>, transform_indices = @transform_9, window_bounds = array<i64: 2, 32>}, {pipeline_mode = #tpu.pipeline_mode<synchronous>, transform_indices = @transform_10, window_bounds = array<i64: 8, 16>}, {pipeline_mode = #tpu.pipeline_mode<synchronous>, transform_indices = @transform_11, window_bounds = array<i64: 16, 8>}, {pipeline_mode = #tpu.pipeline_mode<synchronous>, transform_indices = @transform_12, window_bounds = array<i64: 16, 32>}, {pipeline_mode = #tpu.pipeline_mode<synchronous>, transform_indices = @transform_13, window_bounds = array<i64: 8, 32>}]} {
    %c0 = arith.constant 0 : index
    %c0_0 = arith.constant 0 : index
    %0 = vector.load %arg3[%c0, %c0_0] : memref<1x32xf32, #tpu.memory_space<vmem>>, vector<1x32xf32>
    %c0_1 = arith.constant 0 : index
    %c0_2 = arith.constant 0 : index
    %1 = vector.load %arg4[%c0_1, %c0_2] : memref<1x32xf32, #tpu.memory_space<vmem>>, vector<1x32xf32>
    %c0_3 = arith.constant 0 : index
    %c0_4 = arith.constant 0 : index
    %2 = vector.load %arg1[%c0_3, %c0_4] : memref<16x32xf32, #tpu.memory_space<vmem>>, vector<16x32xf32>
    %cst = arith.constant dense<0.000000e+00> : vector<32xf32>
    %3 = vector.multi_reduction <add>, %2, %cst [0] : vector<16x32xf32> to vector<32xf32>
    %4 = vector.shape_cast %3 : vector<32xf32> to vector<1x32xf32>
    %cst_5 = arith.constant 6.250000e-02 : f32
    %5 = vector.broadcast %cst_5 : f32 to vector<1x32xf32>
    %6 = arith.mulf %4, %5 : vector<1x32xf32>
    %7 = arith.mulf %2, %2 : vector<16x32xf32>
    %cst_6 = arith.constant dense<0.000000e+00> : vector<32xf32>
    %8 = vector.multi_reduction <add>, %7, %cst_6 [0] : vector<16x32xf32> to vector<32xf32>
    %9 = vector.shape_cast %8 : vector<32xf32> to vector<1x32xf32>
    %cst_7 = arith.constant 6.250000e-02 : f32
    %10 = vector.broadcast %cst_7 : f32 to vector<1x32xf32>
    %11 = arith.mulf %9, %10 : vector<1x32xf32>
    %12 = arith.mulf %6, %6 : vector<1x32xf32>
    %13 = arith.subf %11, %12 : vector<1x32xf32>
    %14 = vector.broadcast %6 : vector<1x32xf32> to vector<16x32xf32>
    %15 = arith.subf %2, %14 : vector<16x32xf32>
    %cst_8 = arith.constant 9.99999974E-6 : f32
    %16 = vector.broadcast %cst_8 : f32 to vector<1x32xf32>
    %17 = arith.addf %13, %16 : vector<1x32xf32>
    %18 = math.rsqrt %17 : vector<1x32xf32>
    %19 = vector.broadcast %18 : vector<1x32xf32> to vector<16x32xf32>
    %20 = arith.mulf %15, %19 : vector<16x32xf32>
    %21 = vector.broadcast %0 : vector<1x32xf32> to vector<16x32xf32>
    %22 = arith.mulf %20, %21 : vector<16x32xf32>
    %23 = vector.broadcast %1 : vector<1x32xf32> to vector<16x32xf32>
    %24 = arith.addf %22, %23 : vector<16x32xf32>
    %c0_9 = arith.constant 0 : index
    %c0_10 = arith.constant 0 : index
    %25 = vector.load %arg5[%c0_9, %c0_10] : memref<32x32xf32, #tpu.memory_space<vmem>>, vector<32x32xf32>
    %cst_11 = arith.constant dense<0.000000e+00> : vector<16x32xf32>
    %26 = tpu.matmul %24, %25, %cst_11 {dimension_numbers = #tpu.dot_dimension_numbers<[1], [0], [0], [1], [0, 0, 1, 1], [], []>} : vector<16x32xf32>, vector<32x32xf32>, vector<16x32xf32> -> vector<16x32xf32>
    %c0_12 = arith.constant 0 : index
    %c0_13 = arith.constant 0 : index
    %27 = vector.load %arg6[%c0_12, %c0_13] : memref<1x32xf32, #tpu.memory_space<vmem>>, vector<1x32xf32>
    %28 = vector.broadcast %27 : vector<1x32xf32> to vector<16x32xf32>
    %29 = arith.addf %26, %28 : vector<16x32xf32>
    %c0_14 = arith.constant 0 : index
    %c0_15 = arith.constant 0 : index
    %30 = vector.load %arg2[%c0_14, %c0_15] : memref<8x32xf32, #tpu.memory_space<vmem>>, vector<8x32xf32>
    %cst_16 = arith.constant dense<0.000000e+00> : vector<32xf32>
    %31 = vector.multi_reduction <add>, %30, %cst_16 [0] : vector<8x32xf32> to vector<32xf32>
    %32 = vector.shape_cast %31 : vector<32xf32> to vector<1x32xf32>
    %cst_17 = arith.constant 1.250000e-01 : f32
    %33 = vector.broadcast %cst_17 : f32 to vector<1x32xf32>
    %34 = arith.mulf %32, %33 : vector<1x32xf32>
    %35 = arith.mulf %30, %30 : vector<8x32xf32>
    %cst_18 = arith.constant dense<0.000000e+00> : vector<32xf32>
    %36 = vector.multi_reduction <add>, %35, %cst_18 [0] : vector<8x32xf32> to vector<32xf32>
    %37 = vector.shape_cast %36 : vector<32xf32> to vector<1x32xf32>
    %cst_19 = arith.constant 1.250000e-01 : f32
    %38 = vector.broadcast %cst_19 : f32 to vector<1x32xf32>
    %39 = arith.mulf %37, %38 : vector<1x32xf32>
    %40 = arith.mulf %34, %34 : vector<1x32xf32>
    %41 = arith.subf %39, %40 : vector<1x32xf32>
    %42 = vector.broadcast %34 : vector<1x32xf32> to vector<8x32xf32>
    %43 = arith.subf %30, %42 : vector<8x32xf32>
    %cst_20 = arith.constant 9.99999974E-6 : f32
    %44 = vector.broadcast %cst_20 : f32 to vector<1x32xf32>
    %45 = arith.addf %41, %44 : vector<1x32xf32>
    %46 = math.rsqrt %45 : vector<1x32xf32>
    %47 = vector.broadcast %46 : vector<1x32xf32> to vector<8x32xf32>
    %48 = arith.mulf %43, %47 : vector<8x32xf32>
    %49 = vector.broadcast %0 : vector<1x32xf32> to vector<8x32xf32>
    %50 = arith.mulf %48, %49 : vector<8x32xf32>
    %51 = vector.broadcast %1 : vector<1x32xf32> to vector<8x32xf32>
    %52 = arith.addf %50, %51 : vector<8x32xf32>
    %c0_21 = arith.constant 0 : index
    %c0_22 = arith.constant 0 : index
    %53 = vector.load %arg7[%c0_21, %c0_22] : memref<32x32xf32, #tpu.memory_space<vmem>>, vector<32x32xf32>
    %cst_23 = arith.constant dense<0.000000e+00> : vector<8x32xf32>
    %54 = tpu.matmul %52, %53, %cst_23 {dimension_numbers = #tpu.dot_dimension_numbers<[1], [0], [0], [1], [0, 0, 1, 1], [], []>} : vector<8x32xf32>, vector<32x32xf32>, vector<8x32xf32> -> vector<8x32xf32>
    %c0_24 = arith.constant 0 : index
    %c0_25 = arith.constant 0 : index
    %55 = vector.load %arg8[%c0_24, %c0_25] : memref<1x32xf32, #tpu.memory_space<vmem>>, vector<1x32xf32>
    %56 = vector.broadcast %55 : vector<1x32xf32> to vector<8x32xf32>
    %57 = arith.addf %54, %56 : vector<8x32xf32>
    %c0_26 = arith.constant 0 : index
    %c0_27 = arith.constant 0 : index
    %58 = vector.load %arg9[%c0_26, %c0_27] : memref<2x32xf32, #tpu.memory_space<vmem>>, vector<2x32xf32>
    %59 = vector.extract_strided_slice %58 {offsets = [0, 0], sizes = [1, 32], strides = [1, 1]} : vector<2x32xf32> to vector<1x32xf32>
    %cst_28 = arith.constant dense<0.000000e+00> : vector<1x16xf32>
    %60 = tpu.matmul %59, %29, %cst_28 {dimension_numbers = #tpu.dot_dimension_numbers<[1], [1], [0], [0], [0, 0, 1, 0], [], []>} : vector<1x32xf32>, vector<16x32xf32>, vector<1x16xf32> -> vector<1x16xf32>
    %61 = vector.extract_strided_slice %58 {offsets = [1, 0], sizes = [1, 32], strides = [1, 1]} : vector<2x32xf32> to vector<1x32xf32>
    %62 = vector.broadcast %61 : vector<1x32xf32> to vector<8x32xf32>
    %63 = arith.mulf %57, %62 : vector<8x32xf32>
    %cst_29 = arith.constant dense<0.000000e+00> : vector<8xf32>
    %64 = vector.multi_reduction <add>, %63, %cst_29 [1] : vector<8x32xf32> to vector<8xf32>
    %65 = vector.shape_cast %64 : vector<8xf32> to vector<8x1xf32>
    %c0_30 = arith.constant 0 : index
    %c0_31 = arith.constant 0 : index
    %66 = vector.load %arg11[%c0_30, %c0_31] : memref<8x16xi8, #tpu.memory_space<vmem>>, vector<8x16xi8>
    %c0_i8 = arith.constant 0 : i8
    %67 = vector.broadcast %c0_i8 : i8 to vector<8x16xi8>
    %68 = arith.cmpi ne, %66, %67 : vector<8x16xi8>
    %69 = arith.extui %68 : vector<8x16xi1> to vector<8x16xi32>
    %70 = arith.sitofp %69 : vector<8x16xi32> to vector<8x16xf32>
    %71 = vector.broadcast %65 : vector<8x1xf32> to vector<8x16xf32>
    %72 = vector.broadcast %60 : vector<1x16xf32> to vector<8x16xf32>
    %73 = arith.addf %71, %72 : vector<8x16xf32>
    %cst_32 = arith.constant 0.000000e+00 : f32
    %74 = vector.broadcast %cst_32 : f32 to vector<8x16xf32>
    %75 = arith.cmpf oge, %73, %74 : vector<8x16xf32>
    %cst_33 = arith.constant 2.000000e-01 : f32
    %76 = vector.broadcast %cst_33 : f32 to vector<8x16xf32>
    %77 = arith.mulf %76, %73 : vector<8x16xf32>
    %78 = arith.select %75, %73, %77 : vector<8x16xi1>, vector<8x16xf32>
    %cst_34 = arith.constant -1.000000e+30 : f32
    %79 = vector.broadcast %cst_34 : f32 to vector<8x16xf32>
    %80 = arith.select %68, %78, %79 : vector<8x16xi1>, vector<8x16xf32>
    %cst_35 = arith.constant dense<0xFF800000> : vector<8xf32>
    %81 = vector.multi_reduction <maximumf>, %80, %cst_35 [1] : vector<8x16xf32> to vector<8xf32>
    %82 = vector.shape_cast %81 : vector<8xf32> to vector<8x1xf32>
    %83 = vector.broadcast %82 : vector<8x1xf32> to vector<8x16xf32>
    %84 = arith.subf %80, %83 : vector<8x16xf32>
    %85 = math.exp %84 : vector<8x16xf32>
    %86 = arith.mulf %85, %70 : vector<8x16xf32>
    %cst_36 = arith.constant dense<0.000000e+00> : vector<8xf32>
    %87 = vector.multi_reduction <add>, %86, %cst_36 [1] : vector<8x16xf32> to vector<8xf32>
    %88 = vector.shape_cast %87 : vector<8xf32> to vector<8x1xf32>
    %cst_37 = arith.constant 0.000000e+00 : f32
    %89 = vector.broadcast %cst_37 : f32 to vector<8x1xf32>
    %90 = arith.cmpf ogt, %88, %89 : vector<8x1xf32>
    %cst_38 = arith.constant 1.000000e+00 : f32
    %91 = vector.broadcast %cst_38 : f32 to vector<8x1xf32>
    %92 = arith.select %90, %88, %91 : vector<8x1xi1>, vector<8x1xf32>
    %93 = tpu.reciprocal %92 {approx = true} : vector<8x1xf32> -> vector<8x1xf32>
    %94 = vector.broadcast %93 : vector<8x1xf32> to vector<8x16xf32>
    %95 = arith.mulf %86, %94 : vector<8x16xf32>
    %cst_39 = arith.constant dense<0.000000e+00> : vector<8x32xf32>
    %96 = tpu.matmul %95, %29, %cst_39 {dimension_numbers = #tpu.dot_dimension_numbers<[1], [0], [0], [1], [0, 0, 1, 1], [], []>} : vector<8x16xf32>, vector<16x32xf32>, vector<8x32xf32> -> vector<8x32xf32>
    %cst_40 = arith.constant 0.000000e+00 : f32
    %97 = vector.broadcast %cst_40 : f32 to vector<8x32xf32>
    %98 = arith.maximumf %96, %97 : vector<8x32xf32>
    %c0_41 = arith.constant 0 : index
    %c0_42 = arith.constant 0 : index
    %99 = vector.load %arg14[%c0_41, %c0_42] : memref<8x32xf32, #tpu.memory_space<vmem>>, vector<8x32xf32>
    tpu.vector_store %arg14[%c0_41, %c0_42], %98 {strides = array<i32>} : memref<8x32xf32, #tpu.memory_space<vmem>>, vector<8x32xf32>,
    %c0_43 = arith.constant 0 : index
    %c0_44 = arith.constant 0 : index
    %100 = vector.load %arg10[%c0_43, %c0_44] : memref<2x32xf32, #tpu.memory_space<vmem>>, vector<2x32xf32>
    %101 = vector.extract_strided_slice %100 {offsets = [0, 0], sizes = [1, 32], strides = [1, 1]} : vector<2x32xf32> to vector<1x32xf32>
    %cst_45 = arith.constant dense<0.000000e+00> : vector<1x8xf32>
    %102 = tpu.matmul %101, %57, %cst_45 {dimension_numbers = #tpu.dot_dimension_numbers<[1], [1], [0], [0], [0, 0, 1, 0], [], []>} : vector<1x32xf32>, vector<8x32xf32>, vector<1x8xf32> -> vector<1x8xf32>
    %103 = vector.extract_strided_slice %100 {offsets = [1, 0], sizes = [1, 32], strides = [1, 1]} : vector<2x32xf32> to vector<1x32xf32>
    %104 = vector.broadcast %103 : vector<1x32xf32> to vector<16x32xf32>
    %105 = arith.mulf %29, %104 : vector<16x32xf32>
    %cst_46 = arith.constant dense<0.000000e+00> : vector<16xf32>
    %106 = vector.multi_reduction <add>, %105, %cst_46 [1] : vector<16x32xf32> to vector<16xf32>
    %107 = vector.shape_cast %106 : vector<16xf32> to vector<16x1xf32>
    %c0_47 = arith.constant 0 : index
    %c0_48 = arith.constant 0 : index
    %108 = vector.load %arg12[%c0_47, %c0_48] : memref<16x8xi8, #tpu.memory_space<vmem>>, vector<16x8xi8>
    %c0_i8_49 = arith.constant 0 : i8
    %109 = vector.broadcast %c0_i8_49 : i8 to vector<16x8xi8>
    %110 = arith.cmpi ne, %108, %109 : vector<16x8xi8>
    %111 = arith.extui %110 : vector<16x8xi1> to vector<16x8xi32>
    %112 = arith.sitofp %111 : vector<16x8xi32> to vector<16x8xf32>
    %113 = vector.broadcast %107 : vector<16x1xf32> to vector<16x8xf32>
    %114 = vector.broadcast %102 : vector<1x8xf32> to vector<16x8xf32>
    %115 = arith.addf %113, %114 : vector<16x8xf32>
    %cst_50 = arith.constant 0.000000e+00 : f32
    %116 = vector.broadcast %cst_50 : f32 to vector<16x8xf32>
    %117 = arith.cmpf oge, %115, %116 : vector<16x8xf32>
    %cst_51 = arith.constant 2.000000e-01 : f32
    %118 = vector.broadcast %cst_51 : f32 to vector<16x8xf32>
    %119 = arith.mulf %118, %115 : vector<16x8xf32>
    %120 = arith.select %117, %115, %119 : vector<16x8xi1>, vector<16x8xf32>
    %cst_52 = arith.constant -1.000000e+30 : f32
    %121 = vector.broadcast %cst_52 : f32 to vector<16x8xf32>
    %122 = arith.select %110, %120, %121 : vector<16x8xi1>, vector<16x8xf32>
    %cst_53 = arith.constant dense<0xFF800000> : vector<16xf32>
    %123 = vector.multi_reduction <maximumf>, %122, %cst_53 [1] : vector<16x8xf32> to vector<16xf32>
    %124 = vector.shape_cast %123 : vector<16xf32> to vector<16x1xf32>
    %125 = vector.broadcast %124 : vector<16x1xf32> to vector<16x8xf32>
    %126 = arith.subf %122, %125 : vector<16x8xf32>
    %127 = math.exp %126 : vector<16x8xf32>
    %128 = arith.mulf %127, %112 : vector<16x8xf32>
    %cst_54 = arith.constant dense<0.000000e+00> : vector<16xf32>
    %129 = vector.multi_reduction <add>, %128, %cst_54 [1] : vector<16x8xf32> to vector<16xf32>
    %130 = vector.shape_cast %129 : vector<16xf32> to vector<16x1xf32>
    %cst_55 = arith.constant 0.000000e+00 : f32
    %131 = vector.broadcast %cst_55 : f32 to vector<16x1xf32>
    %132 = arith.cmpf ogt, %130, %131 : vector<16x1xf32>
    %cst_56 = arith.constant 1.000000e+00 : f32
    %133 = vector.broadcast %cst_56 : f32 to vector<16x1xf32>
    %134 = arith.select %132, %130, %133 : vector<16x1xi1>, vector<16x1xf32>
    %135 = tpu.reciprocal %134 {approx = true} : vector<16x1xf32> -> vector<16x1xf32>
    %136 = vector.broadcast %135 : vector<16x1xf32> to vector<16x8xf32>
    %137 = arith.mulf %128, %136 : vector<16x8xf32>
    %cst_57 = arith.constant dense<0.000000e+00> : vector<16x32xf32>
    %138 = tpu.matmul %137, %57, %cst_57 {dimension_numbers = #tpu.dot_dimension_numbers<[1], [0], [0], [1], [0, 0, 1, 1], [], []>} : vector<16x8xf32>, vector<8x32xf32>, vector<16x32xf32> -> vector<16x32xf32>
    %cst_58 = arith.constant 0.000000e+00 : f32
    %139 = vector.broadcast %cst_58 : f32 to vector<16x32xf32>
    %140 = arith.maximumf %138, %139 : vector<16x32xf32>
    %c0_59 = arith.constant 0 : index
    %c0_60 = arith.constant 0 : index
    %141 = vector.load %arg13[%c0_59, %c0_60] : memref<16x32xf32, #tpu.memory_space<vmem>>, vector<16x32xf32>
    tpu.vector_store %arg13[%c0_59, %c0_60], %140 {strides = array<i32>} : memref<16x32xf32, #tpu.memory_space<vmem>>, vector<16x32xf32>,
    return
  }
  func.func @transform_0(%arg0: i32) -> (i32, i32) {
    %c0_i32 = arith.constant 0 : i32
    %c0_i32_0 = arith.constant 0 : i32
    %c0_i32_1 = arith.constant 0 : i32
    return %c0_i32, %c0_i32_0 : i32, i32
  }
  func.func @transform_1(%arg0: i32) -> (i32, i32) {
    %c0_i32 = arith.constant 0 : i32
    %c0_i32_0 = arith.constant 0 : i32
    %c0_i32_1 = arith.constant 0 : i32
    return %c0_i32, %c0_i32_0 : i32, i32
  }
  func.func @transform_2(%arg0: i32) -> (i32, i32) {
    %c0_i32 = arith.constant 0 : i32
    %c0_i32_0 = arith.constant 0 : i32
    %c0_i32_1 = arith.constant 0 : i32
    return %c0_i32, %c0_i32_0 : i32, i32
  }
  func.func @transform_3(%arg0: i32) -> (i32, i32) {
    %c0_i32 = arith.constant 0 : i32
    %c0_i32_0 = arith.constant 0 : i32
    %c0_i32_1 = arith.constant 0 : i32
    return %c0_i32, %c0_i32_0 : i32, i32
  }
  func.func @transform_4(%arg0: i32) -> (i32, i32) {
    %c0_i32 = arith.constant 0 : i32
    %c0_i32_0 = arith.constant 0 : i32
    %c0_i32_1 = arith.constant 0 : i32
    return %c0_i32, %c0_i32_0 : i32, i32
  }
  func.func @transform_5(%arg0: i32) -> (i32, i32) {
    %c0_i32 = arith.constant 0 : i32
    %c0_i32_0 = arith.constant 0 : i32
    %c0_i32_1 = arith.constant 0 : i32
    return %c0_i32, %c0_i32_0 : i32, i32
  }
  func.func @transform_6(%arg0: i32) -> (i32, i32) {
    %c0_i32 = arith.constant 0 : i32
    %c0_i32_0 = arith.constant 0 : i32
    %c0_i32_1 = arith.constant 0 : i32
    return %c0_i32, %c0_i32_0 : i32, i32
  }
  func.func @transform_7(%arg0: i32) -> (i32, i32) {
    %c0_i32 = arith.constant 0 : i32
    %c0_i32_0 = arith.constant 0 : i32
    %c0_i32_1 = arith.constant 0 : i32
    return %c0_i32, %c0_i32_0 : i32, i32
  }
  func.func @transform_8(%arg0: i32) -> (i32, i32) {
    %c0_i32 = arith.constant 0 : i32
    %c0_i32_0 = arith.constant 0 : i32
    %c0_i32_1 = arith.constant 0 : i32
    return %c0_i32, %c0_i32_0 : i32, i32
  }
  func.func @transform_9(%arg0: i32) -> (i32, i32) {
    %c0_i32 = arith.constant 0 : i32
    %c0_i32_0 = arith.constant 0 : i32
    %c0_i32_1 = arith.constant 0 : i32
    return %c0_i32, %c0_i32_0 : i32, i32
  }
  func.func @transform_10(%arg0: i32) -> (i32, i32) {
    %c0_i32 = arith.constant 0 : i32
    %c0_i32_0 = arith.constant 0 : i32
    %c0_i32_1 = arith.constant 0 : i32
    return %c0_i32, %c0_i32_0 : i32, i32
  }
  func.func @transform_11(%arg0: i32) -> (i32, i32) {
    %c0_i32 = arith.constant 0 : i32
    %c0_i32_0 = arith.constant 0 : i32
    %c0_i32_1 = arith.constant 0 : i32
    return %c0_i32, %c0_i32_0 : i32, i32
  }
  func.func @transform_12(%arg0: i32) -> (i32, i32) {
    %c0_i32 = arith.constant 0 : i32
    %c0_i32_0 = arith.constant 0 : i32
    %c0_i32_1 = arith.constant 0 : i32
    return %c0_i32, %c0_i32_0 : i32, i32
  }
  func.func @transform_13(%arg0: i32) -> (i32, i32) {
    %c0_i32 = arith.constant 0 : i32
    %c0_i32_0 = arith.constant 0 : i32
    %c0_i32_1 = arith.constant 0 : i32
    return %c0_i32, %c0_i32_0 : i32, i32
  }
}

</mosaic_0001>

<bundles_post_ra>
// kernel: tpu_custom_call.1
= control target key start
LH: loop header
LB: loop body
LE: loop exit
PB: predicated region body
PF: predicated region fallthrough
CT: control target
= control target key end

     0   :  { %19 = vsyncpa [#allocation3], 0  ;;  %s1283_s0 = inlined_call_operand.hbm [shape: f32[16,32], index: 0, kind: input, shape index: {}]   ;;  %s1284_s1 = inlined_call_operand.hbm [shape: f32[8,32], index: 1, kind: input, shape index: {}]   ;;  %s1285_s2 = inlined_call_operand.vmem [shape: f32[1,32], index: 2, kind: input, shape index: {}]   ;;  %s1286_s3 = inlined_call_operand.vmem [shape: f32[1,32], index: 3, kind: input, shape index: {}]   ;;  %s1287_s4 = inlined_call_operand.hbm [shape: f32[32,32], index: 4, kind: input, shape index: {}]   ;;  %s1288_s5 = inlined_call_operand.vmem [shape: f32[1,32], index: 5, kind: input, shape index: {}]   ;;  %s1289_s6 = inlined_call_operand.hbm [shape: f32[32,32], index: 6, kind: input, shape index: {}]   ;;  %s1290_s7 = inlined_call_operand.vmem [shape: f32[1,32], index: 7, kind: input, shape index: {}]   ;;  %s1291_s8 = inlined_call_operand.vmem [shape: f32[2,32], index: 8, kind: input, shape index: {}]   ;;  %s1292_s9 = inlined_call_operand.vmem [shape: f32[2,32], index: 9, kind: input, shape index: {}]   ;;  %s1293_s10 = inlined_call_operand.vmem [shape: s8[8,16], index: 10, kind: input, shape index: {}]   ;;  %s1294_s11 = inlined_call_operand.vmem [shape: s8[16,8], index: 11, kind: input, shape index: {}]   ;;  %s1295_s12 = inlined_call_operand.hbm [shape: f32[16,32], index: 12, kind: output, shape index: {0}]   ;;  %s1296_s13 = inlined_call_operand.hbm [shape: f32[8,32], index: 13, kind: output, shape index: {1}]  }
   0x1   :  { %20 = vsyncpa [#allocation6], 0 }
   0x2   :  { %21 = vsyncpa [#allocation9], 0 }
   0x3   :  { %22 = vsyncpa [#allocation4], 0 }
   0x4   :  { %23 = vsyncpa [#allocation12], 0  ;;  %s1054_s25 = smov [#allocation5]   ;;  %s1055_s27 = smov [#allocation2]  }
   0x5   :  { %s42_s26 = sshll.u32 %s1054_s25, 4  ;;  %s29_s28 = sshll.u32 %s1055_s27, 4  ;;  %s43_s26 = int_to_ptr.vmem [resolvable:$true] %s42_s26  ;;  %s30_s28 = int_to_ptr.vmem [resolvable:$true] %s29_s28 }
   0x6   :  { %s932_s29 = scalar_lea.vmem %s43_s26, 128  ;;  %p937_p1 = scmp.lt.s32.totalorder %s43_s26, %s43_s26 }
   0x7   :  { %p933_p0 = scmp.ne.s32.totalorder %s43_s26, %s932_s29  ;;  %p938_p2 = scmp.lt.s32.totalorder %s932_s29, %s932_s29 }
   0x9   :  { %p939_p3 = por %p938_p2, %p937_p1 }
   0xb   :  { %p940_p4 = pnand %p939_p3, %p933_p0 }
   0xd   :  { %943 = shalt.err (!%p940_p4)
}
   0xe   :  { %45 = dma.hbm_to_vmem [thread:$0]  %s1284_s1, 128, %s43_s26, [#allocation6]  }
   0xf   :  { %s952_s15 = scalar_lea.vmem %s30_s28, 256  ;;  %p957_p6 = scmp.lt.s32.totalorder %s30_s28, %s30_s28 }
  0x10   :  { %p953_p5 = scmp.ne.s32.totalorder %s30_s28, %s952_s15  ;;  %p958_p7 = scmp.lt.s32.totalorder %s952_s15, %s952_s15 }
  0x12   :  { %p959_p8 = por %p958_p7, %p957_p6 }
  0x14   :  { %p960_p9 = pnand %p959_p8, %p953_p5 }
  0x16   :  { %963 = shalt.err (!%p960_p9)
}
  0x17   :  { %s1056_s16 = smov 128   ;;  %s1057_s17 = smov 8  }
  0x18   :  { %35 = dma.hbm_to_vmem [thread:$0]  %s1283_s0, 256, %s30_s28, [#allocation3], %s1056_s16, %s1056_s16, %s1057_s17  }
  0x19   :  { %s1058_s20 = smov [#allocation7]   ;;  %s1059_s22 = smov [#allocation8]  }
  0x1a   :  { %s55_s21 = sshll.u32 %s1058_s20, 4  ;;  %s69_s1 = sshll.u32 %s1059_s22, 4  ;;  %s56_s21 = int_to_ptr.vmem [resolvable:$true] %s55_s21  ;;  %s70_s1 = int_to_ptr.vmem [resolvable:$true] %s69_s1 }
  0x1b   :  { %s972_s23 = scalar_lea.vmem %s56_s21, 512  ;;  %p977_p11 = scmp.lt.s32.totalorder %s56_s21, %s56_s21 }
  0x1c   :  { %p973_p10 = scmp.ne.s32.totalorder %s56_s21, %s972_s23  ;;  %p978_p12 = scmp.lt.s32.totalorder %s972_s23, %s972_s23 }
  0x1e   :  { %p979_p13 = por %p978_p12, %p977_p11 }
  0x20   :  { %p980_p0 = pnand %p979_p13, %p973_p10 }
  0x22   :  { %983 = shalt.err (!%p980_p0)
}
  0x23   :  { %61 = dma.hbm_to_vmem [thread:$0]  %s1287_s4, 512, %s56_s21, [#allocation6], %s1056_s16, %s1056_s16, %s1057_s17  }
  0x24   :  { %s992_s0 = scalar_lea.vmem %s70_s1, 512  ;;  %p997_p2 = scmp.lt.s32.totalorder %s70_s1, %s70_s1 }
  0x25   :  { %p993_p1 = scmp.ne.s32.totalorder %s70_s1, %s992_s0  ;;  %p998_p3 = scmp.lt.s32.totalorder %s992_s0, %s992_s0 }
  0x27   :  { %p999_p4 = por %p998_p3, %p997_p2 }
  0x29   :  { %p1000_p5 = pnand %p999_p4, %p993_p1 }
  0x2b   :  { %1003 = shalt.err (!%p1000_p5)
}
  0x2c   :  { %75 = dma.hbm_to_vmem [thread:$0]  %s1289_s6, 512, %s70_s1, [#allocation9], %s1056_s16, %s1056_s16, %s1057_s17  }
  0x2d   :  { %1044 = dma.done.wait [#allocation3], 256  }
  0x2e   :  { %1045 = vsyncadd [#allocation3], 4294967040 }
  0x2f   :  { %1046 = dma.done.wait [#allocation6], 640  }
  0x30   :  { %1047 = vsyncadd [#allocation6], 4294966656 }
  0x31   :  { %1048 = dma.done.wait [#allocation9], 512  }
  0x32   :  { %1049 = vsyncadd [#allocation9], 4294966784  ;;  %v1060_v0 = vmov 0.0   ;;  %vm1061_vm0 = vmmov 0   ;;  %v154_v1 = vld [vmem:[#allocation7 + $0x18] sm:$0xff]  ;;  %v153_v2 = vld [vmem:[#allocation7 + $0x10] sm:$0xff] }
  0x33   :  { %862 = vmatprep.subr.mxu1 %v1060_v0  ;;  %870 = vmatprep.mubr.msk.f32.mxu1 %vm1061_vm0, %v1060_v0  ;;  %vm104_vm1 = vcmask 261120   ;;  %v152_v3 = vld [vmem:[#allocation7 + $0x8] sm:$0xff]  ;;  %v1161_v5 = vld [vmem:[#allocation2 + $0x8] sm:$0xff]  ;;  %v1163_v6 = vld [vmem:[#allocation5] sm:$0xff]  ;;  %vm457_vm5 = vcmask 130048   ;;  %vm664_vm13 = vcmask 64512  }
  0x34   :  { %851 = vmatprep.subr.mxu0 %v154_v1  ;;  %v1159_v4 = vld [vmem:[#allocation2] sm:$0xff]  ;;  %v106_v8 = vsel %vm104_vm1, %v1161_v5, 0.0  ;;  %v116_v10 = vmul.f32 %v1161_v5, %v1161_v5  ;;  %v272_v11 = vld [vmem:[#allocation8 + $0x18] sm:$0xff]  ;;  %v271_v12 = vld [vmem:[#allocation8 + $0x10] sm:$0xff]  ;;  %v244_v15 = vsel %vm104_vm1, %v1163_v6, 0.0  ;;  %v252_v16 = vmul.f32 %v1163_v6, %v1163_v6 }
  0x35   :  { %852 = vmatpush3.msra.mxu0 %v154_v1  ;;  %v105_v7 = vsel %vm104_vm1, %v1159_v4, 0.0  ;;  %v115_v9 = vmul.f32 %v1159_v4, %v1159_v4  ;;  %v151_v13 = vld [vmem:[#allocation7] sm:$0xff]  ;;  %863 = vmatpush3.msra.mxu1 %v272_v11  ;;  %v245_v19 = vrot.slane %v244_v15, 4  ;;  %v270_v20 = vld [vmem:[#allocation8 + $0x8] sm:$0xff] }
  0x36   :  { %853 = vmatprep.subr.mxu0 %v153_v2  ;;  %v107_v14 = vadd.f32 %v106_v8, %v105_v7  ;;  %v118_v18 = vsel %vm104_vm1, %v116_v10, 0.0  ;;  %864 = vmatprep.subr.mxu1 %v1060_v0  ;;  %v253_v23 = vsel %vm104_vm1, %v252_v16, 0.0  ;;  %v269_v26 = vld [vmem:[#allocation8] sm:$0xff]  ;;  %v811_v62 = vld [vmem:[%s1285_s2] ss:$0 sm:$0xff] }
  0x37   :  { %854 = vmatpush3.msra.mxu0 %v153_v2  ;;  %v117_v17 = vsel %vm104_vm1, %v115_v9, 0.0  ;;  %865 = vmatpush3.msra.mxu1 %v271_v12  ;;  %v246_v24 = vadd.f32 %v245_v19, %v244_v15  ;;  %v254_v25 = vrot.slane %v253_v23, 4  ;;  %v1213_v15 = vld [vmem:[%s1292_s9] sm:$0x3] }
  0x38   :  { %855 = vmatprep.subr.mxu0 %v152_v3  ;;  %v108_v21 = vrot.slane %v107_v14, 4  ;;  %v119_v22 = vadd.f32 %v118_v18, %v117_v17  ;;  %866 = vmatprep.subr.mxu1 %v1060_v0  ;;  %v813_v17 = vld [vmem:[%s1288_s5] ss:$0 sm:$0xff] }
  0x39   :  { %856 = vmatpush3.msra.mxu0 %v152_v3  ;;  %867 = vmatpush3.msra.mxu1 %v270_v20  ;;  %v247_v29 = vrot.slane %v246_v24, 2  ;;  %v255_v30 = vadd.f32 %v254_v25, %v253_v23  ;;  %v812_v3 = vld [vmem:[%s1286_s3] ss:$0 sm:$0xff] }
  0x3a   :  { %857 = vmatprep.subr.mxu0 %v151_v13  ;;  %v109_v27 = vadd.f32 %v108_v21, %v107_v14  ;;  %v120_v28 = vrot.slane %v119_v22, 4  ;;  %868 = vmatprep.subr.mxu1 %v1060_v0  ;;  %v816_v14 = vld [vmem:[%s1290_s7] ss:$0 sm:$0xff] }
  0x3b   :  { %858 = vmatpush3.msra.mxu0 %v151_v13  ;;  %869 = vmatpush3.msra.mxu1 %v269_v26  ;;  %v248_v33 = vadd.f32 %v247_v29, %v246_v24  ;;  %v256_v34 = vrot.slane %v255_v30, 2  ;;  %v353_v13 = vld [vmem:[%s1291_s8] sm:$0x3] }
  0x3c   :  { %873 = vmatprep.subr.mxu0 %v1060_v0  ;;  %v110_v31 = vrot.slane %v109_v27, 2  ;;  %v121_v32 = vadd.f32 %v120_v28, %v119_v22  ;;  %880 = vmatprep.subr.mxu1 %v1060_v0 }
  0x3d   :  { %v249_v37 = vrot.slane %v248_v33, 1  ;;  %v257_v38 = vadd.f32 %v256_v34, %v255_v30  ;;  %v441_v30 = vld [vmem:[%s1293_s10] sm:$0x3] }
  0x3e   :  { %v111_v35 = vadd.f32 %v110_v31, %v109_v27  ;;  %v122_v36 = vrot.slane %v121_v32, 2  ;;  %vm442_vm2 = vnez %v441_v30 }
  0x3f   :  { %v250_v41 = vadd.f32 %v249_v37, %v248_v33  ;;  %v258_v42 = vrot.slane %v257_v38, 1 }
  0x40   :  { %v112_v39 = vrot.slane %v111_v35, 1  ;;  %v123_v40 = vadd.f32 %v122_v36, %v121_v32  ;;  %v1062_v32 = vmov 0  }
  0x41   :  { %v251_v45 = vmul.f32 0.125, %v250_v41  ;;  %v259_v46 = vadd.f32 %v258_v42, %v257_v38  ;;  %v443_v33 = vsel %vm442_vm2, 16843009, %v1062_v32 }
  0x42   :  { %v113_v43 = vadd.f32 %v112_v39, %v111_v35  ;;  %v124_v44 = vrot.slane %v123_v40, 1  ;;  %v444_v37 = vunpack.c.0.s8 %v443_v33 }
  0x43   :  { %v260_v49 = vmul.f32 0.125, %v259_v46  ;;  %v261_v50 = vmul.f32 %v251_v45, %v251_v45  ;;  %v263_v57 = vsub.f32 %v1163_v6, %v251_v45 }
  0x44   :  { %v114_v47 = vmul.f32 0.0625, %v113_v43  ;;  %v125_v48 = vadd.f32 %v124_v44, %v123_v40  ;;  %vm445_vm3 = vcmp.ne.s32.totalorder %v444_v37, 0 }
  0x45   :  { %v262_v53 = vsub.f32 %v260_v49, %v261_v50 }
  0x46   :  { %v126_v51 = vmul.f32 0.0625, %v125_v48  ;;  %v127_v52 = vmul.f32 %v114_v47, %v114_v47  ;;  %v129_v58 = vsub.f32 %v1159_v4, %v114_v47  ;;  %v130_v59 = vsub.f32 %v1161_v5, %v114_v47 }
  0x47   :  { %v264_v55 = vadd.f32 1e-05, %v262_v53  ;;  %v433_v5 = vlaneseq  ;;  %v821_v48 = vsel %vm445_vm3, 1.0, %v1060_v0 }
  0x48   :  { %v128_v54 = vsub.f32 %v126_v51, %v127_v52 }
  0x49   :  { %908 = vrsqrt.f32 %v264_v55  ;;  %v1201_v11 = vshrl.u32 %v433_v5, 7 }
  0x4a   :  { %v131_v56 = vadd.f32 1e-05, %v128_v54 }
  0x4b   :  { %v435_v12 = vsub.s32 1, %v1201_v11  ;;  %v450_v31 = vsub.s32 0, %v1201_v11 }
  0x4c   :  { %910 = vrsqrt.f32 %v131_v56 }
  0x4d   :  { %v436_v16 = vrot.slane %v353_v13, %v435_v12  ;;  %v627_v20 = vrot.slane %v1213_v15, %v435_v12 }
  0x56   :  { %v909_v60 = vpop.eup %908 }
  0x57   :  { %v266_v63 = vmul.f32 %v909_v60, %v263_v57  ;;  %v636_v57 = vld [vmem:[%s1294_s11] sm:$0x3] }
  0x58   :  { %vm638_vm7 = vnez %v636_v57 }
  0x59   :  { %v911_v61 = vpop.eup %910  ;;  %v267_v7 = vmul.f32 %v811_v62, %v266_v63 }
  0x5a   :  { %v133_v1 = vmul.f32 %v911_v61, %v129_v58  ;;  %v134_v2 = vmul.f32 %v911_v61, %v130_v59  ;;  %v637_v58 = vld [vmem:[%s1294_s11 + $0x2] sm:$0x3]  ;;  %v640_v61 = vsel %vm638_vm7, 16843009, %v1062_v32  ;;  %s1063_s11 = smov [#allocation11]  }
  0x5b   :  { %v268_v9 = vadd.f32 %v812_v3, %v267_v7  ;;  %vm639_vm8 = vnez %v637_v58  ;;  %s796_s22 = sshll.u32 %s1063_s11, 4  ;;  %s797_s22 = int_to_ptr.vmem [resolvable:$true] %s796_s22 }
  0x5c   :  { %v141_v8 = vmul.f32 %v811_v62, %v133_v1  ;;  %v142_v6 = vmul.f32 %v811_v62, %v134_v2  ;;  %v641_v62 = vsel %vm639_vm8, 16843009, %v1062_v32  ;;  %v642_v2 = vunpack.c.0.s8 %v640_v61  ;;  %s1004_s1 = scalar_lea.vmem %s797_s22, 128  ;;  %p1009_p7 = scmp.lt.s32.totalorder %s797_s22, %s797_s22 }
  0x5d   :  { %871 = vmatmul.mubr.msk.f32.vlgmr.msra.gmra.mxu1 %vm104_vm1, %v268_v9  ;;  %p1005_p6 = scmp.ne.s32.totalorder %s797_s22, %s1004_s1  ;;  %p1010_p8 = scmp.lt.s32.totalorder %s1004_s1, %s1004_s1 }
  0x5e   :  { %v149_v4 = vadd.f32 %v812_v3, %v141_v8  ;;  %v150_v10 = vadd.f32 %v812_v3, %v142_v6  ;;  %884 = vmatprep.mubr.msk.f32.mxu1 %vm1061_vm0, %v1060_v0  ;;  %v643_v3 = vunpack.c.0.s8 %v641_v62  ;;  %vm1248_vm9 = vcmp.ne.s32.totalorder %v642_v2, 0 }
  0x5f   :  { %p1011_p9 = por %p1010_p8, %p1009_p7 }
  0x60   :  { %859 = vmatprep.mubr.msk.f32.mxu0 %vm104_vm1, %v149_v4  ;;  %vm1252_vm10 = vcmp.ne.s32.totalorder %v643_v3, 0 }
  0x61   :  { %860 = vmatmul.mubr.msk.f32.vlgmr.msra.gmra.mxu0 %vm104_vm1, %v150_v10  ;;  %p1012_p10 = pnand %p1011_p9, %p1005_p6 }
  0x62   :  { %877 = vmatprep.mubr.msk.f32.mxu0 %vm1061_vm0, %v1060_v0 }
 0x11d   :  { %v349_v18 = vpop.f32.mrf.mxu1 }
 0x11e   :  { %v350_v19 = vadd.f32 %v816_v14, %v349_v18 }
 0x11f   :  { %v872_v22 = vpop.f32.mrf.mxu1 }
 0x120   :  { %v437_v24 = vmul.f32 %v436_v16, %v350_v19 }
 0x121   :  { %v861_v21 = vpop.f32.mrf.mxu0 }
 0x122   :  { %v240_v23 = vadd.f32 %v861_v21, %v813_v17  ;;  %v438_v27 = vsel %vm104_vm1, %v437_v24, 0.0 }
 0x123   :  { %v234_v25 = vpop.f32.mrf.mxu0  ;;  %439 = vadd.xlane.f32.xlu0 %v438_v27  ;;  %v826_v27 = vsel %vm1252_vm10, 1.0, %v1060_v0 }
 0x124   :  { %v235_v26 = vadd.f32 %v813_v17, %v234_v25  ;;  %874 = vmatpush3.xpose.msk.msra.mxu0 %vm104_vm1, %v240_v23  ;;  %881 = vmatpush3.msra.mxu1 %v240_v23  ;;  %v629_v28 = vmul.f32 %v627_v20, %v240_v23 }
 0x125   :  { %882 = vmatprep.subr.mxu1 %v1060_v0  ;;  %875 = vmatprep.subr.mxu0 %v1060_v0 }
 0x126   :  { %883 = vmatpush3.msra.mxu1 %v235_v26  ;;  %v628_v29 = vmul.f32 %v627_v20, %v235_v26  ;;  %v633_v44 = vsel %vm104_vm1, %v629_v28, 0.0 }
 0x127   :  { %887 = vmatprep.subr.mxu1 %v1060_v0 }
 0x128   :  { %876 = vmatpush3.xpose.msk.msra.mxu0 %vm104_vm1, %v235_v26  ;;  %v630_v52 = vsel %vm104_vm1, %v628_v29, 0.0  ;;  %v825_v26 = vsel %vm1248_vm9, 1.0, %v1060_v0 }
 0x129   :  { %892 = vmatprep.subr.mxu0 %v350_v19 }
 0x12b   :  { %878 = vmatmul.mubr.msk.f32.vlgmr.msra.gmra.mxu0 %vm104_vm1, %v353_v13 }
 0x12c   :  { %893 = vmatpush3.msra.mxu0 %v350_v19 }
 0x1ac   :  { %v440_v35 = vpop.xlane.xlu0 %439 }
 0x1eb   :  { %v429_v34 = vpop.f32.mrf.mxu0 }
 0x1ec   :  { %v451_v36 = vrot.slane %v429_v34, %v450_v31 }
 0x1ed   :  { %v879_v38 = vpop.f32.mrf.mxu0 }
 0x1ee   :  { %v452_v39 = vadd.f32 %v451_v36, %v440_v35 }
 0x1f0   :  { %v454_v40 = vmul.f32 0.2, %v452_v39  ;;  %vm453_vm4 = vcmp.ge.f32.partialorder %v452_v39, 0.0 }
 0x1f2   :  { %v455_v41 = vsel %vm453_vm4, %v452_v39, %v454_v40 }
 0x1f3   :  { %v456_v42 = vsel %vm445_vm3, %v455_v41, -1e+30 }
 0x1f4   :  { %v458_v43 = vsel %vm457_vm5, %v456_v42, -inf }
 0x1f5   :  { %459 = vmax.xlane.f32.xlu0 %v458_v43 }
 0x1f9   :  { %634 = vadd.xlane.f32.xlu0 %v633_v44 }
 0x27e   :  { %v460_v45 = vpop.xlane.xlu0 %459 }
 0x27f   :  { %v461_v46 = vsub.f32 %v456_v42, %v460_v45 }
 0x281   :  { %v462_v47 = vmul.f32 1.442695, %v461_v46 }
 0x282   :  { %v635_v7 = vpop.xlane.xlu0 %634 }
 0x283   :  { %912 = vpow2.f32 %v462_v47 }
 0x290   :  { %v913_v49 = vpop.eup %912 }
 0x291   :  { %v464_v50 = vmul.f32 %v913_v49, %v821_v48 }
 0x293   :  { %v465_v51 = vsel %vm457_vm5, %v464_v50, 0.0 }
 0x294   :  { %466 = vadd.xlane.f32.xlu1 %v465_v51 }
 0x298   :  { %631 = vadd.xlane.f32.xlu1 %v630_v52 }
 0x31d   :  { %v467_v53 = vpop.xlane.xlu1 %466 }
 0x31e   :  { %vm468_vm6 = vcmp.gt.f32.partialorder %v467_v53, 0.0 }
 0x31f   :  { %v469_v54 = vsel %vm468_vm6, %v467_v53, 1.0 }
 0x320   :  { %914 = vrcp.f32 %v469_v54 }
 0x321   :  { %v632_v6 = vpop.xlane.xlu1 %631 }
 0x32d   :  { %v915_v55 = vpop.eup %914 }
 0x32e   :  { %v471_v56 = vmul.f32 %v915_v55, %v464_v50 }
 0x330   :  { %885 = vmatmul.mubr.msk.f32.vlgmr.msra.gmra.mxu1 %vm457_vm5, %v471_v56 }
 0x331   :  { %888 = vmatpush3.xpose.msk.msra.mxu1 %vm104_vm1, %v350_v19  ;;  %889 = vmatprep.mubr.msk.f32.mxu1 %vm1061_vm0, %v1060_v0 }
 0x334   :  { %890 = vmatmul.mubr.msk.f32.vlgmr.msra.gmra.mxu1 %vm104_vm1, %v1213_v15 }
 0x3f0   :  { %v541_v59 = vpop.f32.mrf.mxu1 }
 0x3f1   :  { %v545_v60 = vmax.f32 %v541_v59, 0.0 }
 0x3f2   :  { %v886_v63 = vpop.f32.mrf.mxu1 }
 0x3f3   :  { %546 = vst.msk [vmem:[#allocation11] sm:$0xff] %vm104_vm1, %v545_v60 }
 0x3f4   :  { %v620_v1 = vpop.f32.mrf.mxu1 }
 0x3f5   :  { %v653_v8 = vrot.slane %v620_v1, %v450_v31 }
 0x3f6   :  { %v891_v9 = vpop.f32.mrf.mxu1 }
 0x3f7   :  { %v654_v4 = vadd.f32 %v653_v8, %v632_v6  ;;  %v655_v10 = vadd.f32 %v653_v8, %v635_v7 }
 0x3f9   :  { %vm656_vm11 = vcmp.ge.f32.partialorder %v654_v4, 0.0  ;;  %v658_v12 = vmul.f32 0.2, %v654_v4  ;;  %vm657_vm12 = vcmp.ge.f32.partialorder %v655_v10, 0.0  ;;  %v659_v13 = vmul.f32 0.2, %v655_v10 }
 0x3fb   :  { %v660_v14 = vsel %vm656_vm11, %v654_v4, %v658_v12  ;;  %v661_v15 = vsel %vm657_vm12, %v655_v10, %v659_v13 }
 0x3fc   :  { %v662_v16 = vsel %vm1248_vm9, %v660_v14, -1e+30  ;;  %v663_v17 = vsel %vm1252_vm10, %v661_v15, -1e+30 }
 0x3fd   :  { %v665_v18 = vsel %vm664_vm13, %v662_v16, -inf  ;;  %v668_v19 = vsel %vm664_vm13, %v663_v17, -inf }
 0x3fe   :  { %666 = vmax.xlane.f32.xlu1 %v665_v18  ;;  %669 = vmax.xlane.f32.xlu0 %v668_v19 }
 0x487   :  { %v667_v20 = vpop.xlane.xlu1 %666  ;;  %v670_v21 = vpop.xlane.xlu0 %669 }
 0x488   :  { %v671_v22 = vsub.f32 %v662_v16, %v667_v20  ;;  %v672_v23 = vsub.f32 %v663_v17, %v670_v21 }
 0x48a   :  { %v673_v24 = vmul.f32 1.442695, %v671_v22  ;;  %v675_v25 = vmul.f32 1.442695, %v672_v23 }
 0x48c   :  { %916 = vpow2.f32 %v673_v24 }
 0x48d   :  { %918 = vpow2.f32 %v675_v25 }
 0x499   :  { %v917_v28 = vpop.eup %916 }
 0x49a   :  { %v919_v29 = vpop.eup %918  ;;  %v677_v30 = vmul.f32 %v917_v28, %v825_v26 }
 0x49b   :  { %v678_v31 = vmul.f32 %v919_v29, %v826_v27 }
 0x49c   :  { %v679_v32 = vsel %vm664_vm13, %v677_v30, 0.0 }
 0x49d   :  { %680 = vadd.xlane.f32.xlu1 %v679_v32  ;;  %v682_v33 = vsel %vm664_vm13, %v678_v31, 0.0 }
 0x49e   :  { %683 = vadd.xlane.f32.xlu0 %v682_v33 }
 0x526   :  { %v681_v34 = vpop.xlane.xlu1 %680 }
 0x527   :  { %vm685_vm14 = vcmp.gt.f32.partialorder %v681_v34, 0.0  ;;  %v684_v35 = vpop.xlane.xlu0 %683 }
 0x528   :  { %v687_v36 = vsel %vm685_vm14, %v681_v34, 1.0  ;;  %vm686_vm15 = vcmp.gt.f32.partialorder %v684_v35, 0.0 }
 0x529   :  { %920 = vrcp.f32 %v687_v36  ;;  %v688_v37 = vsel %vm686_vm15, %v684_v35, 1.0 }
 0x52a   :  { %922 = vrcp.f32 %v688_v37 }
 0x536   :  { %v921_v38 = vpop.eup %920 }
 0x537   :  { %v923_v0 = vpop.eup %922  ;;  %v691_v39 = vmul.f32 %v921_v38, %v677_v30 }
 0x538   :  { %v692_v40 = vmul.f32 %v923_v0, %v678_v31 }
 0x539   :  { %894 = vmatprep.mubr.msk.f32.mxu0 %vm664_vm13, %v691_v39 }
 0x53a   :  { %895 = vmatmul.mubr.msk.f32.vlgmr.msra.gmra.mxu0 %vm664_vm13, %v692_v40 }
 0x53b   :  { %1015 = shalt.err (!%p1012_p10)
}
 0x53c   :  { %799 = dma.vmem_to_hbm [thread:$0]  %s797_s22, 128, %s1296_s13, [#allocation12]  }
 0x53d   :  { %s1064_s25 = smov [#allocation10]  }
 0x53e   :  { %s783_s0 = sshll.u32 %s1064_s25, 4  ;;  %s784_s0 = int_to_ptr.vmem [resolvable:$true] %s783_s0 }
 0x53f   :  { %s1024_s26 = scalar_lea.vmem %s784_s0, 256  ;;  %p1029_p12 = scmp.lt.s32.totalorder %s784_s0, %s784_s0 }
 0x540   :  { %p1025_p11 = scmp.ne.s32.totalorder %s784_s0, %s1024_s26  ;;  %p1030_p13 = scmp.lt.s32.totalorder %s1024_s26, %s1024_s26 }
 0x542   :  { %p1031_p0 = por %p1030_p13, %p1029_p12 }
 0x544   :  { %p1032_p1 = pnand %p1031_p0, %p1025_p11 }
 0x5fa   :  { %v896_v41 = vpop.f32.mrf.mxu0 }
 0x5fb   :  { %v775_v42 = vmax.f32 %v896_v41, 0.0 }
 0x5fc   :  { %v765_v43 = vpop.f32.mrf.mxu0 }
 0x5fd   :  { %777 = vst.msk [vmem:[#allocation10 + $0x8] sm:$0xff] %vm104_vm1, %v775_v42  ;;  %v774_v44 = vmax.f32 %v765_v43, 0.0 }
 0x5ff   :  { %776 = vst.msk [vmem:[#allocation10] sm:$0xff] %vm104_vm1, %v774_v44 }
 0x600   :  { %1035 = shalt.err (!%p1032_p1)
}
 0x601   :  { %789 = dma.vmem_to_hbm [thread:$0]  %s784_s0, 256, %s1295_s12, [#allocation4], %s1056_s16, %s1056_s16, %s1057_s17  }
 0x602   :  { %1050 = dma.done.wait [#allocation4], 256  }
 0x603   :  { %1051 = vsyncadd [#allocation4], 4294967040 }
 0x604   :  { %1052 = dma.done.wait [#allocation12], 128  }
 0x605   :  { %1053 = vsyncadd [#allocation12], 4294967168 }
 0x606   :  { %806 = vsyncpa [#allocation3], 1 }
 0x607   :  { %807 = vsyncpa [#allocation6], 1 }
 0x608   :  { %808 = vsyncpa [#allocation9], 1 }
 0x609   :  { %809 = vsyncpa [#allocation4], 1 }
 0x60a   :  { %810 = vsyncpa [#allocation12], 1 }

</bundles_post_ra>
